<compile_context>
chip_gen: v7x
topology: tpu7x:2x2x1
jax: 0.10.0
libtpu: 0.0.40
codegen_flags: <defaults>
</compile_context>

<pallas_src>
import jax
import jax.numpy as jnp
from jax.experimental import pallas as pl
from jax.experimental.pallas import tpu as pltpu

LN_EPS = 1e-5  # PyTorch nn.LayerNorm default


def _round_up(x, m):
    return (x + m - 1) // m * m


def _cdiv(a, b):
    return (a + b - 1) // b


def _masklm_kernel(x_ref, w1_ref, b1_ref, gamma_ref, beta_ref,
                   w2_ref, b2_ref, o_ref, hn_ref):
    """Grid = (M tiles, vocab tiles); vocab is the innermost ("arbitrary") axis."""

    @pl.when(pl.program_id(1) == 0)
    def _():
        # Linear(num_inputs -> num_hiddens) + ReLU + LayerNorm, once per M tile.
        # bf16 MXU operands, f32 accumulation and f32 LayerNorm math.
        h = jnp.dot(x_ref[...], w1_ref[...], preferred_element_type=jnp.float32)
        h = jnp.maximum(h + b1_ref[...], 0.0)
        mean = jnp.mean(h, axis=-1, keepdims=True)
        centered = h - mean
        var = jnp.mean(centered * centered, axis=-1, keepdims=True)
        hn = centered * jax.lax.rsqrt(var + LN_EPS)
        hn = hn * gamma_ref[...] + beta_ref[...]
        hn_ref[...] = hn.astype(hn_ref.dtype)

    # Hot loop: (TM, H) @ (H, TN) in bf16 on the MXU, f32 accumulation.
    out = jnp.dot(hn_ref[...], w2_ref[...],
                  preferred_element_type=jnp.float32) + b2_ref[...]
    o_ref[...] = out.astype(o_ref.dtype)


def prepare_params(params, *, tile_n=1024):
    """One-time weight preparation (dtype cast + vocab padding).

    Call ONCE after init / checkpoint load, NOT per forward step: re-casting
    and padding w2 every call reads ~90 MB f32 and writes ~45 MB bf16 of HBM
    at real BERT sizes, comparable to the kernel's own w2 traffic.
    """
    w1, b1 = params["w1"], params["b1"]
    gamma, beta = params["gamma"], params["beta"]
    w2, b2 = params["w2"], params["b2"]

    num_inputs, num_hiddens = w1.shape
    vocab_size = w2.shape[1]

    TN = min(tile_n, _round_up(vocab_size, 128))
    V_pad = _round_up(vocab_size, TN)

    w2_p = jnp.zeros((num_hiddens, V_pad), jnp.bfloat16)
    w2_p = w2_p.at[:, :vocab_size].set(w2.astype(jnp.bfloat16))
    b2_p = jnp.zeros((1, V_pad), jnp.float32)
    b2_p = b2_p.at[:, :vocab_size].set(b2.reshape(1, -1).astype(jnp.float32))
    # TODO(synk): optional fp8(e4m3) w2 + per-column scale for v7x (int8 on
    # v5e/v6e) to halve the dominant w2 HBM stream again; gate behind a flag.

    return {
        "w1": w1.astype(jnp.bfloat16),                        # bf16 MXU operand
        "b1": b1.reshape(1, -1).astype(jnp.float32),
        "gamma": gamma.reshape(1, -1).astype(jnp.float32),
        "beta": beta.reshape(1, -1).astype(jnp.float32),
        "w2": w2_p,                                           # (H, V_pad) bf16
        "b2": b2_p,                                           # (1, V_pad) f32
        "num_inputs": num_inputs,
        "num_hiddens": num_hiddens,
        "vocab_size": vocab_size,
        "tile_n": TN,
    }


def masklm_forward(X, pred_positions, prep, *, tile_m=512,
                   out_dtype=jnp.bfloat16):
    """Pallas implementation of MaskLM.forward.

    X: (batch, seq_len, num_inputs) float
    pred_positions: (batch, num_pred) int32
    prep: output of prepare_params()
    returns: (batch, num_pred, vocab_size) in `out_dtype`
      (bf16 logits by default -- documented precision relaxation vs f32;
       pass out_dtype=jnp.float32 for the exact-writeback variant).
    """
    num_inputs = prep["num_inputs"]
    num_hiddens = prep["num_hiddens"]
    vocab_size = prep["vocab_size"]
    TN = prep["tile_n"]
    w2_p, b2_p = prep["w2"], prep["b2"]
    V_pad = w2_p.shape[1]

    batch, seq_len, _ = X.shape
    num_pred = pred_positions.shape[1]
    M = batch * num_pred

    # ---- Gather X[batch_idx, pred_positions] (cheap glue, stays in XLA) ----
    flat_pos = pred_positions.reshape(-1).astype(jnp.int32)
    batch_idx = jnp.repeat(jnp.arange(batch, dtype=jnp.int32), num_pred)
    flat_idx = batch_idx * seq_len + flat_pos                      # (B*P,)
    masked_X = jnp.take(X.reshape(batch * seq_len, num_inputs),
                        flat_idx, axis=0)                          # (B*P, D)
    # TODO(synk): fuse the gather via PrefetchScalarGridSpec + per-row DMA;
    # it is tiny next to streaming w2, so it stays in the wrapper.

    # ---- M tiling: big TM (w2 is re-streamed once per M tile), >= 2 tiles
    # when possible for v7x megacore, only a few rows of padding waste. ----
    M8 = _round_up(max(M, 1), 8)
    n_m = max(_cdiv(M8, tile_m), 1)
    if n_m == 1 and M8 >= 16:
        n_m = 2                       # keep both v7x TensorCores busy
    TM = _round_up(_cdiv(M8, n_m), 8)
    M_pad = TM * n_m

    x_p = jnp.zeros((M_pad, num_inputs), jnp.bfloat16)
    x_p = x_p.at[:M].set(masked_X.astype(jnp.bfloat16))

    grid = (n_m, V_pad // TN)

    # ---- Scoped-VMEM budget: double-buffered x/w1/w2/b2/out + hn scratch ----
    out_bytes = jnp.dtype(out_dtype).itemsize
    vmem_est = (2 * TM * num_inputs * 2              # x blocks (bf16)
                + 2 * num_inputs * num_hiddens * 2   # w1 (bf16)
                + 2 * 4 * (3 * num_hiddens + TN)     # b1/gamma/beta/b2 (f32)
                + 2 * num_hiddens * TN * 2           # w2 blocks (bf16)
                + 2 * TM * TN * out_bytes            # out blocks
                + TM * num_hiddens * 2)              # hn scratch (bf16)
    vmem_limit = min(96 * 1024 * 1024,
                     max(32 * 1024 * 1024, int(vmem_est * 3) // 2))

    # Truthful cost estimate: layer-1 flops once per row; w2 / b2 bytes once
    # per M tile (the actual re-streaming); logits writeback in out_dtype.
    cost = pl.CostEstimate(
        flops=(2 * M_pad * num_inputs * num_hiddens
               + 2 * M_pad * num_hiddens * V_pad),
        transcendentals=M_pad,                           # one rsqrt per row
        bytes_accessed=(M_pad * num_inputs * 2           # x (bf16), once
                        + num_inputs * num_hiddens * 2   # w1 (bf16), once
                        + 4 * 3 * num_hiddens            # b1/gamma/beta
                        + n_m * num_hiddens * V_pad * 2  # w2, once per M tile
                        + n_m * V_pad * 4                # b2, once per M tile
                        + M_pad * V_pad * out_bytes),    # logits writeback
    )

    out_p = pl.pallas_call(
        _masklm_kernel,
        out_shape=jax.ShapeDtypeStruct((M_pad, V_pad), out_dtype),
        grid_spec=pltpu.PrefetchScalarGridSpec(
            num_scalar_prefetch=0,
            grid=grid,
            in_specs=[
                pl.BlockSpec((TM, num_inputs), lambda i, j: (i, 0)),
                pl.BlockSpec((num_inputs, num_hiddens), lambda i, j: (0, 0)),
                pl.BlockSpec((1, num_hiddens), lambda i, j: (0, 0)),
                pl.BlockSpec((1, num_hiddens), lambda i, j: (0, 0)),
                pl.BlockSpec((1, num_hiddens), lambda i, j: (0, 0)),
                pl.BlockSpec((num_hiddens, TN), lambda i, j: (0, j)),
                pl.BlockSpec((1, TN), lambda i, j: (0, j)),
            ],
            out_specs=pl.BlockSpec((TM, TN), lambda i, j: (i, j)),
            scratch_shapes=[pltpu.VMEM((TM, num_hiddens), jnp.bfloat16)],
        ),
        # NOTE: the vocab axis must stay "arbitrary": the pl.when(j == 0)
        # prologue fills the hn scratch reused by all later vocab steps.
        compiler_params=pltpu.CompilerParams(
            dimension_semantics=("parallel", "arbitrary"),
            vmem_limit_bytes=vmem_limit),
        cost_estimate=cost,
    )(x_p, prep["w1"], prep["b1"], prep["gamma"], prep["beta"], w2_p, b2_p)

    # TODO(synk): when M*H*2B fits VMEM, a vocab-outer variant that keeps the
    # full (M, H) bf16 hn resident streams w2 exactly once (roofline minimum).
    return out_p[:M, :vocab_size].reshape(batch, num_pred, vocab_size)


def init_params(key, vocab_size, num_hiddens, num_inputs):
    k1, k2, k3, k4 = jax.random.split(key, 4)
    scale1 = 1.0 / jnp.sqrt(num_inputs)
    scale2 = 1.0 / jnp.sqrt(num_hiddens)
    return {
        "w1": jax.random.uniform(k1, (num_inputs, num_hiddens), jnp.float32,
                                 -scale1, scale1),
        "b1": jax.random.uniform(k2, (num_hiddens,), jnp.float32,
                                 -scale1, scale1),
        "gamma": jnp.ones((num_hiddens,), jnp.float32),
        "beta": jnp.zeros((num_hiddens,), jnp.float32),
        "w2": jax.random.uniform(k3, (num_hiddens, vocab_size), jnp.float32,
                                 -scale2, scale2),
        "b2": jax.random.uniform(k4, (vocab_size,), jnp.float32,
                                 -scale2, scale2),
    }


def _reference(X, pred_positions, params):
    batch, seq_len, num_inputs = X.shape
    num_pred = pred_positions.shape[1]
    flat_pos = pred_positions.reshape(-1)
    batch_idx = jnp.repeat(jnp.arange(batch), num_pred)
    masked_X = X[batch_idx, flat_pos]                       # (B*P, D)
    h = jnp.maximum(masked_X @ params["w1"] + params["b1"], 0.0)
    mean = h.mean(-1, keepdims=True)
    var = ((h - mean) ** 2).mean(-1, keepdims=True)
    hn = (h - mean) / jnp.sqrt(var + LN_EPS) * params["gamma"] + params["beta"]
    out = hn @ params["w2"] + params["b2"]
    return out.reshape(batch, num_pred, -1)


if __name__ == "__main__":
    key = jax.random.PRNGKey(0)
    kx, kp, kw = jax.random.split(key, 3)

    batch, seq_len, num_inputs = 2, 8, 32
    num_hiddens, vocab_size, num_pred = 32, 128, 4

    X = jax.random.normal(kx, (batch, seq_len, num_inputs), jnp.float32)
    pred_positions = jax.random.randint(kp, (batch, num_pred), 0, seq_len,
                                        dtype=jnp.int32)
    params = init_params(kw, vocab_size, num_hiddens, num_inputs)
    prep = prepare_params(params)     # one-time cast / pad (NOT per forward)

    out = masklm_forward(X, pred_positions, prep)
    out = jax.block_until_ready(out)

    ref = _reference(X, pred_positions, params)
    assert out.shape == (batch, num_pred, vocab_size)
    # bf16 operands and bf16 logits (f32 accumulation) -> relaxed tolerance.
    out_f32 = out.astype(jnp.float32)
    err = float(jnp.max(jnp.abs(out_f32 - ref)))
    assert jnp.allclose(out_f32, ref, atol=7.5e-2, rtol=5e-2), err

    print("KERNEL_OK")
</pallas_src>

<mosaic_0001>
module attributes {stable_mosaic.version = 11 : i64} {
  func.func @_masklm_kernel(%arg0: i32, %arg1: i32, %arg2: memref<8x32xbf16, #tpu.memory_space<vmem>>, %arg3: memref<32x32xbf16, #tpu.memory_space<vmem>>, %arg4: memref<1x32xf32, #tpu.memory_space<vmem>>, %arg5: memref<1x32xf32, #tpu.memory_space<vmem>>, %arg6: memref<1x32xf32, #tpu.memory_space<vmem>>, %arg7: memref<32x128xbf16, #tpu.memory_space<vmem>>, %arg8: memref<1x128xf32, #tpu.memory_space<vmem>>, %arg9: memref<8x128xbf16, #tpu.memory_space<vmem>>, %arg10: memref<8x32xbf16, #tpu.memory_space<vmem>>) attributes {dimension_semantics = [#tpu.dimension_semantics<parallel>, #tpu.dimension_semantics<arbitrary>], iteration_bounds = array<i64: 1, 1>, scalar_prefetch = 0 : i64, scratch_operands = 1 : i64, tpu.core_type = #tpu.core_type<tc>, window_params = [{transform_indices = @transform_0, window_bounds = array<i64: 8, 32>}, {pipeline_mode = #tpu.pipeline_mode<synchronous>, transform_indices = @transform_1, window_bounds = array<i64: 32, 32>}, {pipeline_mode = #tpu.pipeline_mode<synchronous>, transform_indices = @transform_2, window_bounds = array<i64: 1, 32>}, {pipeline_mode = #tpu.pipeline_mode<synchronous>, transform_indices = @transform_3, window_bounds = array<i64: 1, 32>}, {pipeline_mode = #tpu.pipeline_mode<synchronous>, transform_indices = @transform_4, window_bounds = array<i64: 1, 32>}, {transform_indices = @transform_5, window_bounds = array<i64: 32, 128>}, {transform_indices = @transform_6, window_bounds = array<i64: 1, 128>}, {transform_indices = @transform_7, window_bounds = array<i64: 8, 128>}]} {
    %c0_i32 = arith.constant 0 : i32
    %0 = arith.cmpi eq, %arg1, %c0_i32 : i32
    %1 = arith.extui %0 : i1 to i32
    %c0_i32_0 = arith.constant 0 : i32
    %2 = arith.cmpi ne, %1, %c0_i32_0 : i32
    scf.if %2 {
      %c0_8 = arith.constant 0 : index
      %c0_9 = arith.constant 0 : index
      %11 = vector.load %arg2[%c0_8, %c0_9] : memref<8x32xbf16, #tpu.memory_space<vmem>>, vector<8x32xbf16>
      %c0_10 = arith.constant 0 : index
      %c0_11 = arith.constant 0 : index
      %12 = vector.load %arg3[%c0_10, %c0_11] : memref<32x32xbf16, #tpu.memory_space<vmem>>, vector<32x32xbf16>
      %cst_12 = arith.constant dense<0.000000e+00> : vector<8x32xf32>
      %13 = tpu.matmul %11, %12, %cst_12 {dimension_numbers = #tpu.dot_dimension_numbers<[1], [0], [0], [1], [0, 0, 1, 1], [], []>} : vector<8x32xbf16>, vector<32x32xbf16>, vector<8x32xf32> -> vector<8x32xf32>
      %c0_13 = arith.constant 0 : index
      %c0_14 = arith.constant 0 : index
      %14 = vector.load %arg4[%c0_13, %c0_14] : memref<1x32xf32, #tpu.memory_space<vmem>>, vector<1x32xf32>
      %15 = vector.broadcast %14 : vector<1x32xf32> to vector<8x32xf32>
      %16 = arith.addf %13, %15 : vector<8x32xf32>
      %cst_15 = arith.constant 0.000000e+00 : f32
      %17 = vector.broadcast %cst_15 : f32 to vector<8x32xf32>
      %18 = arith.maximumf %16, %17 : vector<8x32xf32>
      %cst_16 = arith.constant dense<0.000000e+00> : vector<8xf32>
      %19 = vector.multi_reduction <add>, %18, %cst_16 [1] : vector<8x32xf32> to vector<8xf32>
      %20 = vector.shape_cast %19 : vector<8xf32> to vector<8x1xf32>
      %cst_17 = arith.constant 3.200000e+01 : f32
      %21 = vector.broadcast %cst_17 : f32 to vector<8x1xf32>
      %22 = arith.divf %20, %21 : vector<8x1xf32>
      %23 = vector.broadcast %22 : vector<8x1xf32> to vector<8x32xf32>
      %24 = arith.subf %18, %23 : vector<8x32xf32>
      %25 = arith.mulf %24, %24 : vector<8x32xf32>
      %cst_18 = arith.constant dense<0.000000e+00> : vector<8xf32>
      %26 = vector.multi_reduction <add>, %25, %cst_18 [1] : vector<8x32xf32> to vector<8xf32>
      %27 = vector.shape_cast %26 : vector<8xf32> to vector<8x1xf32>
      %cst_19 = arith.constant 3.200000e+01 : f32
      %28 = vector.broadcast %cst_19 : f32 to vector<8x1xf32>
      %29 = arith.divf %27, %28 : vector<8x1xf32>
      %cst_20 = arith.constant 9.99999974E-6 : f32
      %30 = vector.broadcast %cst_20 : f32 to vector<8x1xf32>
      %31 = arith.addf %29, %30 : vector<8x1xf32>
      %32 = math.rsqrt %31 : vector<8x1xf32>
      %33 = vector.broadcast %32 : vector<8x1xf32> to vector<8x32xf32>
      %34 = arith.mulf %24, %33 : vector<8x32xf32>
      %c0_21 = arith.constant 0 : index
      %c0_22 = arith.constant 0 : index
      %35 = vector.load %arg5[%c0_21, %c0_22] : memref<1x32xf32, #tpu.memory_space<vmem>>, vector<1x32xf32>
      %36 = vector.broadcast %35 : vector<1x32xf32> to vector<8x32xf32>
      %37 = arith.mulf %34, %36 : vector<8x32xf32>
      %c0_23 = arith.constant 0 : index
      %c0_24 = arith.constant 0 : index
      %38 = vector.load %arg6[%c0_23, %c0_24] : memref<1x32xf32, #tpu.memory_space<vmem>>, vector<1x32xf32>
      %39 = vector.broadcast %38 : vector<1x32xf32> to vector<8x32xf32>
      %40 = arith.addf %37, %39 : vector<8x32xf32>
      %41 = arith.truncf %40 : vector<8x32xf32> to vector<8x32xbf16>
      %c0_25 = arith.constant 0 : index
      %c0_26 = arith.constant 0 : index
      %42 = vector.load %arg10[%c0_25, %c0_26] : memref<8x32xbf16, #tpu.memory_space<vmem>>, vector<8x32xbf16>
      tpu.vector_store %arg10[%c0_25, %c0_26], %41 {strides = array<i32>} : memref<8x32xbf16, #tpu.memory_space<vmem>>, vector<8x32xbf16>,
    } else {
    }
    %c0 = arith.constant 0 : index
    %c0_1 = arith.constant 0 : index
    %3 = vector.load %arg10[%c0, %c0_1] : memref<8x32xbf16, #tpu.memory_space<vmem>>, vector<8x32xbf16>
    %c0_2 = arith.constant 0 : index
    %c0_3 = arith.constant 0 : index
    %4 = vector.load %arg7[%c0_2, %c0_3] : memref<32x128xbf16, #tpu.memory_space<vmem>>, vector<32x128xbf16>
    %cst = arith.constant dense<0.000000e+00> : vector<8x128xf32>
    %5 = tpu.matmul %3, %4, %cst {dimension_numbers = #tpu.dot_dimension_numbers<[1], [0], [0], [1], [0, 0, 1, 1], [], []>} : vector<8x32xbf16>, vector<32x128xbf16>, vector<8x128xf32> -> vector<8x128xf32>
    %c0_4 = arith.constant 0 : index
    %c0_5 = arith.constant 0 : index
    %6 = vector.load %arg8[%c0_4, %c0_5] : memref<1x128xf32, #tpu.memory_space<vmem>>, vector<1x128xf32>
    %7 = vector.broadcast %6 : vector<1x128xf32> to vector<8x128xf32>
    %8 = arith.addf %5, %7 : vector<8x128xf32>
    %9 = arith.truncf %8 : vector<8x128xf32> to vector<8x128xbf16>
    %c0_6 = arith.constant 0 : index
    %c0_7 = arith.constant 0 : index
    %10 = vector.load %arg9[%c0_6, %c0_7] : memref<8x128xbf16, #tpu.memory_space<vmem>>, vector<8x128xbf16>
    tpu.vector_store %arg9[%c0_6, %c0_7], %9 {strides = array<i32>} : memref<8x128xbf16, #tpu.memory_space<vmem>>, vector<8x128xbf16>,
    return
  }
  func.func @transform_0(%arg0: i32, %arg1: i32) -> (i32, i32) {
    %c0_i32 = arith.constant 0 : i32
    %c0_i32_0 = arith.constant 0 : i32
    return %arg0, %c0_i32 : i32, i32
  }
  func.func @transform_1(%arg0: i32, %arg1: i32) -> (i32, i32) {
    %c0_i32 = arith.constant 0 : i32
    %c0_i32_0 = arith.constant 0 : i32
    %c0_i32_1 = arith.constant 0 : i32
    return %c0_i32, %c0_i32_0 : i32, i32
  }
  func.func @transform_2(%arg0: i32, %arg1: i32) -> (i32, i32) {
    %c0_i32 = arith.constant 0 : i32
    %c0_i32_0 = arith.constant 0 : i32
    %c0_i32_1 = arith.constant 0 : i32
    return %c0_i32, %c0_i32_0 : i32, i32
  }
  func.func @transform_3(%arg0: i32, %arg1: i32) -> (i32, i32) {
    %c0_i32 = arith.constant 0 : i32
    %c0_i32_0 = arith.constant 0 : i32
    %c0_i32_1 = arith.constant 0 : i32
    return %c0_i32, %c0_i32_0 : i32, i32
  }
  func.func @transform_4(%arg0: i32, %arg1: i32) -> (i32, i32) {
    %c0_i32 = arith.constant 0 : i32
    %c0_i32_0 = arith.constant 0 : i32
    %c0_i32_1 = arith.constant 0 : i32
    return %c0_i32, %c0_i32_0 : i32, i32
  }
  func.func @transform_5(%arg0: i32, %arg1: i32) -> (i32, i32) {
    %c0_i32 = arith.constant 0 : i32
    %c0_i32_0 = arith.constant 0 : i32
    return %c0_i32, %arg1 : i32, i32
  }
  func.func @transform_6(%arg0: i32, %arg1: i32) -> (i32, i32) {
    %c0_i32 = arith.constant 0 : i32
    %c0_i32_0 = arith.constant 0 : i32
    return %c0_i32, %arg1 : i32, i32
  }
  func.func @transform_7(%arg0: i32, %arg1: i32) -> (i32, i32) {
    %c0_i32 = arith.constant 0 : i32
    return %arg0, %arg1 : i32, i32
  }
}

</mosaic_0001>

<bundles_post_ra>
// kernel: tpu_custom_call.1
= control target key start
LH: loop header
LB: loop body
LE: loop exit
PB: predicated region body
PF: predicated region fallthrough
CT: control target
= control target key end

     0   :  { %12 = vsyncpa [#allocation4], 0  ;;  %s512_s0 = inlined_call_operand.hbm [shape: bf16[8,32], index: 0, kind: input, shape index: {}]   ;;  %s513_s1 = inlined_call_operand.hbm [shape: bf16[32,32], index: 1, kind: input, shape index: {}]   ;;  %s514_s2 = inlined_call_operand.vmem [shape: f32[1,32], index: 2, kind: input, shape index: {}]   ;;  %s515_s3 = inlined_call_operand.vmem [shape: f32[1,32], index: 3, kind: input, shape index: {}]   ;;  %s516_s4 = inlined_call_operand.hbm [shape: f32[1,32], index: 4, kind: input, shape index: {}]   ;;  %s517_s5 = inlined_call_operand.vmem [shape: bf16[32,128], index: 5, kind: input, shape index: {}]   ;;  %s518_s6 = inlined_call_operand.vmem [shape: f32[1,128], index: 6, kind: input, shape index: {}]   ;;  %s519_s7 = inlined_call_operand.hbm [shape: bf16[8,128], index: 7, kind: output, shape index: {}]  }
   0x1   :  { %13 = vsyncpa [#allocation7], 0 }
   0x2   :  { %14 = vsyncpa [#allocation5], 0  ;;  %s397_s24 = smov [#allocation6]   ;;  %s303_s28 = scalar_lea.hbm %s513_s1, 256 }
   0x3   :  { %s30_s25 = sshll.u32 %s397_s24, 4  ;;  %p304_p0 = scmp.ne.s32.totalorder %s513_s1, %s303_s28  ;;  %s31_s25 = int_to_ptr.vmem [resolvable:$true] %s30_s25 }
   0x4   :  { %p307_p1 = scmp.lt.u32.totalorder %s303_s28, %s513_s1 }
   0x6   :  { %p309_p2 = pnand %p307_p1, %p304_p0 }
   0x8   :  { %312 = shalt.err (!%p309_p2)
}
   0x9   :  { %s313_s10 = scalar_lea.vmem %s31_s25, 256  ;;  %p318_p4 = scmp.lt.s32.totalorder %s31_s25, %s31_s25 }
   0xa   :  { %p314_p3 = scmp.ne.s32.totalorder %s31_s25, %s313_s10  ;;  %p319_p5 = scmp.lt.s32.totalorder %s313_s10, %s313_s10 }
   0xc   :  { %p320_p6 = por %p319_p5, %p318_p4 }
   0xe   :  { %p321_p7 = pnand %p320_p6, %p314_p3 }
  0x10   :  { %324 = shalt.err (!%p321_p7)
}
  0x11   :  { %s398_s11 = smov 64   ;;  %s399_s12 = smov 4  }
  0x12   :  { %36 = dma.hbm_to_vmem [thread:$0]  %s513_s1, 256, %s31_s25, [#allocation7], %s398_s11, %s398_s11, %s399_s12  }
  0x13   :  { %s400_s15 = smov [#allocation3]   ;;  %s401_s17 = smov [#allocation8]  }
  0x14   :  { %s21_s16 = sshll.u32 %s400_s15, 4  ;;  %s47_s18 = sshll.u32 %s401_s17, 4  ;;  %s22_s16 = int_to_ptr.vmem [resolvable:$true] %s21_s16  ;;  %s48_s18 = int_to_ptr.vmem [resolvable:$true] %s47_s18 }
  0x15   :  { %s325_s21 = scalar_lea.hbm %s512_s0, 64 }
  0x16   :  { %p326_p8 = scmp.ne.s32.totalorder %s512_s0, %s325_s21  ;;  %p329_p9 = scmp.lt.u32.totalorder %s325_s21, %s512_s0 }
  0x18   :  { %p331_p10 = pnand %p329_p9, %p326_p8 }
  0x1a   :  { %334 = shalt.err (!%p331_p10)
}
  0x1b   :  { %s335_s1 = scalar_lea.vmem %s22_s16, 64  ;;  %p340_p12 = scmp.lt.s32.totalorder %s22_s16, %s22_s16 }
  0x1c   :  { %p336_p11 = scmp.ne.s32.totalorder %s22_s16, %s335_s1  ;;  %p341_p13 = scmp.lt.s32.totalorder %s335_s1, %s335_s1 }
  0x1e   :  { %p342_p0 = por %p341_p13, %p340_p12 }
  0x20   :  { %p343_p1 = pnand %p342_p0, %p336_p11 }
  0x22   :  { %346 = shalt.err (!%p343_p1)
}
  0x23   :  { %24 = dma.hbm_to_vmem [thread:$0]  %s512_s0, 64, %s22_s16, [#allocation4]  }
  0x24   :  { %s347_s30 = scalar_lea.hbm %s516_s4, 16 }
  0x25   :  { %p348_p2 = scmp.ne.s32.totalorder %s516_s4, %s347_s30  ;;  %p351_p3 = scmp.lt.u32.totalorder %s347_s30, %s516_s4 }
  0x27   :  { %p353_p4 = pnand %p351_p3, %p348_p2 }
  0x29   :  { %356 = shalt.err (!%p353_p4)
}
  0x2a   :  { %s357_s12 = scalar_lea.vmem %s48_s18, 16  ;;  %s361_s13 = scalar_lea.vmem %s48_s18, 32 }
  0x2b   :  { %p358_p5 = scmp.ne.s32.totalorder %s48_s18, %s357_s12  ;;  %p362_p6 = scmp.lt.s32.totalorder %s48_s18, %s48_s18 }
  0x2c   :  { %p363_p7 = scmp.lt.s32.totalorder %s361_s13, %s357_s12 }
  0x2e   :  { %p364_p8 = por %p363_p7, %p362_p6 }
  0x30   :  { %p365_p9 = pnand %p364_p8, %p358_p5 }
  0x32   :  { %368 = shalt.err (!%p365_p9)
}
  0x33   :  { %50 = dma.hbm_to_vmem [thread:$0]  %s516_s4, 16, %s48_s18, [#allocation7]  }
  0x34   :  { %391 = dma.done.wait [#allocation4], 64  }
  0x35   :  { %392 = vsyncadd [#allocation4], 4294967232 }
  0x36   :  { %393 = dma.done.wait [#allocation7], 272  }
  0x37   :  { %394 = vsyncadd [#allocation7], 4294967024  ;;  %v402_v0 = vmov 0.0   ;;  %vm403_vm0 = vmmov 0   ;;  %v297_v1 = vld [vmem:[#allocation6] sm:$0xff]   ;;  %v298_v2 = vld [vmem:[#allocation6 + $0x8] sm:$0xff]  }
  0x38   :  { %273 = vmatprep.subr.bf16.mxu0 %v402_v0  ;;  %277 = vmatprep.mubr.msk.bf16.mxu0 %vm403_vm0, %v402_v0  ;;  %v69_v3 = vld [vmem:[#allocation3] sm:$0xf]  ;;  %vm93_vm1 = vcmask 261120   ;;  %v257_v4 = vld [vmem:[%s514_s2] ss:$0 sm:$0xff]  ;;  %v300_v18 = vld [vmem:[%s517_s5 + $0x8] sm:$0xff]  }
  0x39   :  { %281 = vmatprep.subr.bf16.mxu1 %v402_v0  ;;  %285 = vmatprep.mubr.msk.bf16.mxu1 %vm403_vm0, %v402_v0  ;;  %v299_v17 = vld [vmem:[%s517_s5] sm:$0xff]   ;;  %v262_v25 = vld [vmem:[#allocation8] ss:$0 sm:$0xff]  ;;  %vm169_vm2 = vcmask 257024   ;;  %s404_s22 = smov [#allocation9]  }
  0x3a   :  { %274 = vmatpush3.bf16.msra.mxu0 %v297_v1  ;;  %282 = vmatpush3.bf16.msra.mxu1 %v299_v17  ;;  %v261_v23 = vld [vmem:[%s515_s3] ss:$0 sm:$0xff]  ;;  %s247_s23 = sshll.u32 %s404_s22, 4  ;;  %s248_s23 = int_to_ptr.vmem [resolvable:$true] %s247_s23 }
  0x3b   :  { %275 = vmatprep.subr.bf16.mxu0 %v402_v0  ;;  %283 = vmatprep.subr.bf16.mxu1 %v402_v0  ;;  %v263_v30 = vld [vmem:[%s518_s6] ss:$0 sm:$0xff]  ;;  %s369_s3 = scalar_lea.vmem %s248_s23, 64  ;;  %p374_p11 = scmp.lt.s32.totalorder %s248_s23, %s248_s23 }
  0x3c   :  { %p370_p10 = scmp.ne.s32.totalorder %s248_s23, %s369_s3  ;;  %p375_p12 = scmp.lt.s32.totalorder %s369_s3, %s369_s3 }
  0x3e   :  { %276 = vmatpush3.bf16.msra.mxu0 %v298_v2  ;;  %284 = vmatpush3.bf16.msra.mxu1 %v300_v18  ;;  %p376_p13 = por %p375_p12, %p374_p11 }
  0x40   :  { %p377_p0 = pnand %p376_p13, %p370_p10 }
  0x41   :  { %278 = vmatmul.mubr.msk.bf16.vlgmr.msra.gmra.mrb[0].mxu0 %vm93_vm1, %v69_v3 }
 0x114   :  { %v131_v5 = vpop.f32.mrb[0].mxu0 }
 0x115   :  { %v132_v6 = vadd.f32 %v257_v4, %v131_v5  ;;  %v279_v7 = vpop.f32.mrb[1].mxu0 }
 0x116   :  { %v134_v8 = vpop.f32.mrb[2].mxu0 }
 0x117   :  { %v137_v9 = vmax.f32 %v132_v6, 0.0  ;;  %v280_v10 = vpop.f32.mrb[3].mxu0 }
 0x119   :  { %v138_v11 = vsel %vm93_vm1, %v137_v9, 0.0 }
 0x11a   :  { %139 = vadd.xlane.f32.xlu0 %v138_v11 }
 0x1a7   :  { %v140_v12 = vpop.xlane.xlu0 %139 }
 0x1a8   :  { %v142_v13 = vmul.f32 0.03125, %v140_v12 }
 0x1aa   :  { %v143_v14 = vsub.f32 %v137_v9, %v142_v13 }
 0x1ac   :  { %v144_v15 = vmul.f32 %v143_v14, %v143_v14 }
 0x1ae   :  { %v145_v16 = vsel %vm93_vm1, %v144_v15, 0.0 }
 0x1af   :  { %146 = vadd.xlane.f32.xlu0 %v145_v16 }
 0x23c   :  { %v147_v19 = vpop.xlane.xlu0 %146 }
 0x23d   :  { %v148_v20 = vmul.f32 0.03125, %v147_v19 }
 0x23f   :  { %v149_v21 = vadd.f32 1e-05, %v148_v20 }
 0x241   :  { %301 = vrsqrt.f32 %v149_v21 }
 0x24b   :  { %v302_v22 = vpop.eup %301 }
 0x24c   :  { %v151_v24 = vmul.f32 %v302_v22, %v143_v14 }
 0x24e   :  { %v159_v26 = vmul.f32 %v261_v23, %v151_v24 }
 0x250   :  { %v167_v27 = vadd.f32 %v262_v25, %v159_v26 }
 0x252   :  { %v168_v28 = vpack.c.bf16 %v167_v27, %v167_v27 }
 0x254   :  { %170 = vst.msk [vmem:[#allocation2] sm:$0xf] %vm169_vm2, %v168_v28 }
 0x25b   :  { %v171_v29 = vld [vmem:[#allocation2] sm:$0xf] }
 0x25c   :  { %286 = vmatmul.mubr.msk.bf16.vlgmr.msra.gmra.mrb[0].mxu1 %vm93_vm1, %v171_v29 }
 0x32f   :  { %v233_v31 = vpop.f32.mrb[0].mxu1 }
 0x330   :  { %v234_v32 = vadd.f32 %v263_v30, %v233_v31  ;;  %v287_v33 = vpop.f32.mrb[1].mxu1 }
 0x331   :  { %v236_v34 = vpop.f32.mrb[2].mxu1 }
 0x332   :  { %v239_v35 = vpack.c.bf16 %v234_v32, %v234_v32  ;;  %v288_v36 = vpop.f32.mrb[3].mxu1 }
 0x334   :  { %240 = vst [vmem:[#allocation9] sm:$0xf] %v239_v35 }
 0x335   :  { %380 = shalt.err (!%p377_p0)
}
 0x336   :  { %s381_s6 = scalar_lea.hbm %s519_s7, 64 }
 0x337   :  { %p382_p1 = scmp.ne.s32.totalorder %s519_s7, %s381_s6  ;;  %p385_p2 = scmp.lt.u32.totalorder %s381_s6, %s519_s7 }
 0x339   :  { %p387_p3 = pnand %p385_p2, %p382_p1 }
 0x33b   :  { %390 = shalt.err (!%p387_p3)
}
 0x33c   :  { %250 = dma.vmem_to_hbm [thread:$0]  %s248_s23, 64, %s519_s7, [#allocation5]  }
 0x33d   :  { %395 = dma.done.wait [#allocation5], 64  }
 0x33e   :  { %396 = vsyncadd [#allocation5], 4294967232 }
 0x33f   :  { %254 = vsyncpa [#allocation4], 1 }
 0x340   :  { %255 = vsyncpa [#allocation7], 1 }
 0x341   :  { %256 = vsyncpa [#allocation5], 1 }

</bundles_post_ra>
